<compile_context>
chip_gen: v5e
topology: v5e:2x2
jax: 0.10.0
libtpu: 0.0.40
codegen_flags: <defaults>
</compile_context>

<pallas_src>
import jax
import jax.numpy as jnp
from jax.experimental import pallas as pl
from jax.experimental.pallas import tpu as pltpu


def _make_dma_cat_kernel(s_up: int, s_cat: int, bn: int, rem: int, g: int):
    """Pure-DMA concat kernel over flattened rows (all refs live in HBM)."""

    def _copy_rows(xu_hbm, xc_hbm, o_hbm, sems, row0, nrows):
        # out[row0:row0+nrows, 0:s_up]        <- x_up[row0:row0+nrows, :]
        # out[row0:row0+nrows, s_up:s_up+s_cat] <- x_cat[row0:row0+nrows, :]
        cp_up = pltpu.make_async_copy(
            xu_hbm.at[pl.ds(row0, nrows), :],
            o_hbm.at[pl.ds(row0, nrows), pl.ds(0, s_up)],
            sems.at[0],
        )
        cp_cat = pltpu.make_async_copy(
            xc_hbm.at[pl.ds(row0, nrows), :],
            o_hbm.at[pl.ds(row0, nrows), pl.ds(s_up, s_cat)],
            sems.at[1],
        )
        cp_up.start()
        cp_cat.start()
        cp_up.wait()
        cp_cat.wait()

    def kernel(xu_hbm, xc_hbm, o_hbm, sems):
        b = pl.program_id(0)
        row0 = b * bn
        if rem == bn:
            # Batch divides evenly: every grid step moves `bn` rows.
            _copy_rows(xu_hbm, xc_hbm, o_hbm, sems, row0, bn)
        else:
            # Static full/tail split (bn, rem, g are Python ints at trace time).
            @pl.when(b < g - 1)
            def _():
                _copy_rows(xu_hbm, xc_hbm, o_hbm, sems, row0, bn)

            @pl.when(b == g - 1)
            def _():
                _copy_rows(xu_hbm, xc_hbm, o_hbm, sems, row0, rem)

    return kernel


def _make_vmem_cat_kernel(s_up: int, s_cat: int):
    """Fallback: lane-dense VMEM copy kernel (whole arrays as one block)."""

    def kernel(xu_ref, xc_ref, o_ref):
        o_ref[:, 0:s_up] = xu_ref[...]
        o_ref[:, s_up:s_up + s_cat] = xc_ref[...]

    return kernel


def _pick_grid_steps(n: int, row_bytes: int) -> int:
    """>=2 steps when possible (v7x megacore); ~8 MiB of traffic per step."""
    if n <= 1:
        return 1
    total_bytes = 2 * n * row_bytes          # read + write
    g = -(-total_bytes // (8 << 20))         # cdiv(total, 8 MiB)
    g = max(2, min(8, g))
    return min(g, n)


def cat_channels(x_up: jax.Array, x_cat: jax.Array) -> jax.Array:
    """Concatenate NCHW tensors along the channel axis using a Pallas kernel."""
    assert x_up.ndim == 4 and x_cat.ndim == 4
    n, c_up, h, w = x_up.shape
    n2, c_cat, h2, w2 = x_cat.shape
    assert (n, h, w) == (n2, h2, w2), "batch/spatial dims must match"
    assert x_up.dtype == x_cat.dtype
    c_out = c_up + c_cat

    # Flatten channels+spatial into one lane-dense axis (free view for NCHW).
    s_up = c_up * h * w
    s_cat = c_cat * h * w
    s_out = s_up + s_cat
    xu2 = x_up.reshape(n, s_up)
    xc2 = x_cat.reshape(n, s_cat)

    dtype_bytes = jnp.dtype(x_up.dtype).itemsize
    cost = pl.CostEstimate(
        flops=0,
        transcendentals=0,
        bytes_accessed=2 * n * s_out * dtype_bytes,
    )

    g = _pick_grid_steps(n, s_out * dtype_bytes)
    bn = -(-n // g)            # rows per full grid step
    g = -(-n // bn)            # re-derive so the tail block is non-empty
    rem = n - bn * (g - 1)     # rows in the (possibly partial) last step

    dma_call = pl.pallas_call(
        _make_dma_cat_kernel(s_up, s_cat, bn, rem, g),
        out_shape=jax.ShapeDtypeStruct((n, s_out), x_up.dtype),
        grid_spec=pltpu.PrefetchScalarGridSpec(
            num_scalar_prefetch=0,
            grid=(g,),
            in_specs=[
                pl.BlockSpec(memory_space=pl.ANY),   # x_up stays in HBM
                pl.BlockSpec(memory_space=pl.ANY),   # x_cat stays in HBM
            ],
            out_specs=pl.BlockSpec(memory_space=pl.ANY),  # out written via DMA
            scratch_shapes=[pltpu.SemaphoreType.DMA((2,))],
        ),
        compiler_params=pltpu.CompilerParams(
            dimension_semantics=("parallel",),
            has_side_effects=True,
        ),
        cost_estimate=cost,
    )

    try:
        out2 = dma_call(xu2, xc2)
    except Exception:
        # Safety net if HBM->HBM DMA lowering is unavailable: lane-dense VMEM
        # copy path (last dims are multiples of 128; batch dim equals the full
        # array dim, so the (8,128) block rule is satisfied).
        out2 = pl.pallas_call(
            _make_vmem_cat_kernel(s_up, s_cat),
            out_shape=jax.ShapeDtypeStruct((n, s_out), x_up.dtype),
            grid_spec=pltpu.PrefetchScalarGridSpec(
                num_scalar_prefetch=0,
                grid=(1,),
                in_specs=[
                    pl.BlockSpec((n, s_up), lambda i: (0, 0)),
                    pl.BlockSpec((n, s_cat), lambda i: (0, 0)),
                ],
                out_specs=pl.BlockSpec((n, s_out), lambda i: (0, 0)),
            ),
            compiler_params=pltpu.CompilerParams(
                dimension_semantics=("arbitrary",),
            ),
            cost_estimate=cost,
        )(xu2, xc2)

    # Free view back to NCHW.
    return out2.reshape(n, c_out, h, w)


if __name__ == "__main__":
    key = jax.random.PRNGKey(0)
    k1, k2 = jax.random.split(key)

    # Small NCHW inputs consistent with a U-Net skip-connection cat:
    # x_up: (2, 4, 16, 16), x_cat: (2, 6, 16, 16) -> out: (2, 10, 16, 16)
    x_up = jax.random.normal(k1, (2, 4, 16, 16), dtype=jnp.float32)
    x_cat = jax.random.normal(k2, (2, 6, 16, 16), dtype=jnp.float32)

    out = cat_channels(x_up, x_cat)
    jax.block_until_ready(out)

    # Verify against plain JAX reference (torch.cat dim=1 equivalent).
    ref = jnp.concatenate([x_up, x_cat], axis=1)
    assert out.shape == ref.shape, (out.shape, ref.shape)
    assert out.dtype == ref.dtype
    assert jnp.array_equal(out, ref), "Pallas cat does not match reference"

    print("KERNEL_OK")
</pallas_src>

<mosaic_0001>
module attributes {stable_mosaic.version = 11 : i64} {
  func.func @kernel(%arg0: i32, %arg1: memref<2x1024xf32, #tpu.memory_space<any>>, %arg2: memref<2x1536xf32, #tpu.memory_space<any>>, %arg3: memref<2x2560xf32, #tpu.memory_space<any>>, %arg4: memref<2x!tpu.dma_semaphore, #tpu.memory_space<semaphore_mem>>) attributes {dimension_semantics = [#tpu.dimension_semantics<parallel>], iteration_bounds = array<i64: 2>, scalar_prefetch = 0 : i64, scratch_operands = 1 : i64, tpu.core_type = #tpu.core_type<tc>, window_params = [{}, {}, {}]} {
    %c1_i32 = arith.constant 1 : i32
    %0 = arith.muli %arg0, %c1_i32 : i32
    %c0_i32 = arith.constant 0 : i32
    %c0_i32_0 = arith.constant 0 : i32
    %1 = tpu.memref_slice %arg1[%0, %c0_i32_0] : memref<2x1024xf32, #tpu.memory_space<any>> -> memref<1x1024xf32, #tpu.memory_space<any>>
    %c0_i32_1 = arith.constant 0 : i32
    %2 = tpu.memref_slice %arg3[%0, %c0_i32_1] : memref<2x2560xf32, #tpu.memory_space<any>> -> memref<1x1024xf32, #tpu.memory_space<any>>
    %3 = tpu.memref_slice %arg4[%c0_i32] : memref<2x!tpu.dma_semaphore, #tpu.memory_space<semaphore_mem>> -> memref<1x!tpu.dma_semaphore, #tpu.memory_space<semaphore_mem>>
    %4 = tpu.memref_squeeze %3 : memref<1x!tpu.dma_semaphore, #tpu.memory_space<semaphore_mem>> -> memref<!tpu.dma_semaphore, #tpu.memory_space<semaphore_mem>>
    tpu.enqueue_dma source(%1 : memref<1x1024xf32, #tpu.memory_space<any>>) target(%2 : memref<1x1024xf32, #tpu.memory_space<any>>) target_semaphore(%4 : memref<!tpu.dma_semaphore, #tpu.memory_space<semaphore_mem>>)
    %c1_i32_2 = arith.constant 1 : i32
    %c0_i32_3 = arith.constant 0 : i32
    %5 = tpu.memref_slice %arg2[%0, %c0_i32_3] : memref<2x1536xf32, #tpu.memory_space<any>> -> memref<1x1536xf32, #tpu.memory_space<any>>
    %c1024_i32 = arith.constant 1024 : i32
    %6 = tpu.memref_slice %arg3[%0, %c1024_i32] : memref<2x2560xf32, #tpu.memory_space<any>> -> memref<1x1536xf32, #tpu.memory_space<any>>
    %7 = tpu.memref_slice %arg4[%c1_i32_2] : memref<2x!tpu.dma_semaphore, #tpu.memory_space<semaphore_mem>> -> memref<1x!tpu.dma_semaphore, #tpu.memory_space<semaphore_mem>>
    %8 = tpu.memref_squeeze %7 : memref<1x!tpu.dma_semaphore, #tpu.memory_space<semaphore_mem>> -> memref<!tpu.dma_semaphore, #tpu.memory_space<semaphore_mem>>
    tpu.enqueue_dma source(%5 : memref<1x1536xf32, #tpu.memory_space<any>>) target(%6 : memref<1x1536xf32, #tpu.memory_space<any>>) target_semaphore(%8 : memref<!tpu.dma_semaphore, #tpu.memory_space<semaphore_mem>>)
    %c0_i32_4 = arith.constant 0 : i32
    %c0_i32_5 = arith.constant 0 : i32
    %9 = tpu.memref_slice %arg1[%0, %c0_i32_5] : memref<2x1024xf32, #tpu.memory_space<any>> -> memref<1x1024xf32, #tpu.memory_space<any>>
    %c0_i32_6 = arith.constant 0 : i32
    %10 = tpu.memref_slice %arg3[%0, %c0_i32_6] : memref<2x2560xf32, #tpu.memory_space<any>> -> memref<1x1024xf32, #tpu.memory_space<any>>
    %11 = tpu.memref_slice %arg4[%c0_i32_4] : memref<2x!tpu.dma_semaphore, #tpu.memory_space<semaphore_mem>> -> memref<1x!tpu.dma_semaphore, #tpu.memory_space<semaphore_mem>>
    %12 = tpu.memref_squeeze %11 : memref<1x!tpu.dma_semaphore, #tpu.memory_space<semaphore_mem>> -> memref<!tpu.dma_semaphore, #tpu.memory_space<semaphore_mem>>
    tpu.wait_dma2 semaphore(%12 : memref<!tpu.dma_semaphore, #tpu.memory_space<semaphore_mem>>) src(%9 : memref<1x1024xf32, #tpu.memory_space<any>>) dst(%10 : memref<1x1024xf32, #tpu.memory_space<any>>)
    %c1_i32_7 = arith.constant 1 : i32
    %c0_i32_8 = arith.constant 0 : i32
    %13 = tpu.memref_slice %arg2[%0, %c0_i32_8] : memref<2x1536xf32, #tpu.memory_space<any>> -> memref<1x1536xf32, #tpu.memory_space<any>>
    %c1024_i32_9 = arith.constant 1024 : i32
    %14 = tpu.memref_slice %arg3[%0, %c1024_i32_9] : memref<2x2560xf32, #tpu.memory_space<any>> -> memref<1x1536xf32, #tpu.memory_space<any>>
    %15 = tpu.memref_slice %arg4[%c1_i32_7] : memref<2x!tpu.dma_semaphore, #tpu.memory_space<semaphore_mem>> -> memref<1x!tpu.dma_semaphore, #tpu.memory_space<semaphore_mem>>
    %16 = tpu.memref_squeeze %15 : memref<1x!tpu.dma_semaphore, #tpu.memory_space<semaphore_mem>> -> memref<!tpu.dma_semaphore, #tpu.memory_space<semaphore_mem>>
    tpu.wait_dma2 semaphore(%16 : memref<!tpu.dma_semaphore, #tpu.memory_space<semaphore_mem>>) src(%13 : memref<1x1536xf32, #tpu.memory_space<any>>) dst(%14 : memref<1x1536xf32, #tpu.memory_space<any>>)
    return
  }
}

module attributes {stable_mosaic.version = 11 : i64} {
  func.func @kernel(%arg0: i32, %arg1: memref<2x1024xf32, #tpu.memory_space<vmem>>, %arg2: memref<2x1536xf32, #tpu.memory_space<vmem>>, %arg3: memref<2x2560xf32, #tpu.memory_space<vmem>>) attributes {dimension_semantics = [#tpu.dimension_semantics<arbitrary>], iteration_bounds = array<i64: 1>, scalar_prefetch = 0 : i64, scratch_operands = 0 : i64, tpu.core_type = #tpu.core_type<tc>, window_params = [{pipeline_mode = #tpu.pipeline_mode<synchronous>, transform_indices = @transform_0, window_bounds = array<i64: 2, 1024>}, {pipeline_mode = #tpu.pipeline_mode<synchronous>, transform_indices = @transform_1, window_bounds = array<i64: 2, 1536>}, {pipeline_mode = #tpu.pipeline_mode<synchronous>, transform_indices = @transform_2, window_bounds = array<i64: 2, 2560>}]} {
    %c0 = arith.constant 0 : index
    %c0_0 = arith.constant 0 : index
    %0 = vector.load %arg1[%c0, %c0_0] : memref<2x1024xf32, #tpu.memory_space<vmem>>, vector<2x1024xf32>
    %c0_1 = arith.constant 0 : index
    %c0_2 = arith.constant 0 : index
    %1 = vector.load %arg3[%c0_1, %c0_2] : memref<2x2560xf32, #tpu.memory_space<vmem>>, vector<2x1024xf32>
    tpu.vector_store %arg3[%c0_1, %c0_2], %0 {strides = array<i32>} : memref<2x2560xf32, #tpu.memory_space<vmem>>, vector<2x1024xf32>,
    %c0_3 = arith.constant 0 : index
    %c0_4 = arith.constant 0 : index
    %2 = vector.load %arg2[%c0_3, %c0_4] : memref<2x1536xf32, #tpu.memory_space<vmem>>, vector<2x1536xf32>
    %c0_5 = arith.constant 0 : index
    %c1024 = arith.constant 1024 : index
    %3 = vector.load %arg3[%c0_5, %c1024] : memref<2x2560xf32, #tpu.memory_space<vmem>>, vector<2x1536xf32>
    tpu.vector_store %arg3[%c0_5, %c1024], %2 {strides = array<i32>} : memref<2x2560xf32, #tpu.memory_space<vmem>>, vector<2x1536xf32>,
    return
  }
  func.func @transform_0(%arg0: i32) -> (i32, i32) {
    %c0_i32 = arith.constant 0 : i32
    %c0_i32_0 = arith.constant 0 : i32
    %c0_i32_1 = arith.constant 0 : i32
    return %c0_i32, %c0_i32_0 : i32, i32
  }
  func.func @transform_1(%arg0: i32) -> (i32, i32) {
    %c0_i32 = arith.constant 0 : i32
    %c0_i32_0 = arith.constant 0 : i32
    %c0_i32_1 = arith.constant 0 : i32
    return %c0_i32, %c0_i32_0 : i32, i32
  }
  func.func @transform_2(%arg0: i32) -> (i32, i32) {
    %c0_i32 = arith.constant 0 : i32
    %c0_i32_0 = arith.constant 0 : i32
    %c0_i32_1 = arith.constant 0 : i32
    return %c0_i32, %c0_i32_0 : i32, i32
  }
}

</mosaic_0001>

<bundles_post_ra>
// kernel: tpu_custom_call.1
= control target key start
LH: loop header
LB: loop body
LE: loop exit
PB: predicated region body
PF: predicated region fallthrough
CT: control target
= control target key end

     0   :  { %s153_s9 = smov 0   ;;  %s177_s0 = inlined_call_operand.hbm [shape: f32[2,1024], index: 0, kind: input, shape index: {}]   ;;  %s178_s1 = inlined_call_operand.hbm [shape: f32[2,1536], index: 1, kind: input, shape index: {}]   ;;  %s179_s2 = inlined_call_operand.hbm [shape: f32[2,2560], index: 2, kind: output, shape index: {}]  }
   0x1 LB: > { %s159_s10 = sshrl.u32 %s129_s9, 1  ;;  %s15_s11 = sand.u32 1, %s129_s9   ;;  %s129_s9 = sphi %s153_s9, %s12_s9  }
   0x2   : > { %s101_s12 = sshll.u32 %s159_s10, 4  ;;  %s19_s13 = smul.u32 40, %s159_s10 }
   0x3   : > { %s17_s14 = sadd.s32 %s101_s12, %s15_s11  ;;  %s131_s24 = smov 32  }
   0x4   : > { %s18_s17 = scalar_lea.hbm %s177_s0, %s17_s14  ;;  %s20_s18 = sadd.s32 %s19_s13, %s15_s11 }
   0x5   : > { %s21_s21 = scalar_lea.hbm %s179_s2, %s20_s18  ;;  %s26_s22 = sshll.u32 %s18_s17, 4  ;;  %s27_s22 = int_to_ptr.hbm [resolvable:$true] %s26_s22 }
   0x6   : > { %s28_s23 = sshll.u32 %s21_s21, 4  ;;  %33 = sst [smem:[#allocation4]] %s131_s24  ;;  %s29_s23 = int_to_ptr.hbm [resolvable:$true] %s28_s23 }
   0x7   : > { %35 = sst [smem:[#allocation4 + $0x1]] %s131_s24  ;;  %s132_s25 = smov 1  }
   0x8   : > { %37 = sst [smem:[#allocation4 + $0x2]] %s132_s25  ;;  %s133_s26 = smov [#allocation2]  }
   0x9   : > { %s134_s27 = smov [#allocation3]   ;;  %s135_s28 = smov 0  }
   0xa   : > { %39 = dma.general %s27_s22, 128, %s29_s23, %s133_s26, %s134_s27, [#allocation4], %s135_s28, 0  }
   0xb   : > { %s40_s29 = smul.u32 24, %s159_s10  ;;  %s95_s30 = scalar_lea.hbm %s21_s21, 16 }
   0xc   : > { %s52_s3 = sshll.u32 %s95_s30, 4  ;;  %57 = sst [smem:[#allocation6]] %s131_s24  ;;  %s53_s3 = int_to_ptr.hbm [resolvable:$true] %s52_s3 }
   0xd   : > { %59 = sst [smem:[#allocation6 + $0x1]] %s131_s24  ;;  %s41_s4 = sadd.s32 %s40_s29, %s15_s11 }
   0xe   : > { %61 = sst [smem:[#allocation6 + $0x2]] %s132_s25  ;;  %s42_s7 = scalar_lea.hbm %s178_s1, %s41_s4 }
   0xf   : > { %s50_s8 = sshll.u32 %s42_s7, 4  ;;  %s136_s12 = smov [#allocation2 + $0x1]   ;;  %s51_s8 = int_to_ptr.hbm [resolvable:$true] %s50_s8 }
  0x10   : > { %s137_s13 = smov [#allocation5]  }
  0x11   : > { %63 = dma.general %s51_s8, 192, %s53_s3, %s136_s12, %s137_s13, [#allocation6], %s135_s28, 0  }
  0x12   : > { %123 = dma.done.wait [#allocation2], 128 }
  0x13   : > { %124 = vsyncadd [#allocation2], 4294967168 }
  0x14   : > { %125 = dma.done.wait [#allocation2 + $0x1], 192 }
  0x15   : > { %126 = vsyncadd [#allocation2 + $0x1], 4294967104  ;;  %s12_s9 = sadd.s32 1, %s129_s9  }
  0x16   : > { %p9_p0 = scmp.ge.s32.totalorder %s12_s9, 2  }
  0x18   :  { %11 = sbr.rel (!%p9_p0) target bundleno = 1 (0x1), region = 29 }
  0x1d   :  { %70 = vsyncmov [#allocation2] }
  0x20   :  { %s71_s10 = vpop.sfrf %70 }
  0x21   :  { %p102_p1 = scmp.ne.s32.totalorder %s71_s10, 0 }
  0x23   :  { %75 = shalt.err (%p102_p1)  }
  0x24   :  { %77 = vsyncmov [#allocation2 + $0x1] }
  0x27   :  { %s78_s11 = vpop.sfrf %77 }
  0x28   :  { %p103_p2 = scmp.ne.s32.totalorder %s78_s11, 0 }
  0x2a   :  { %82 = shalt.err (%p103_p2)  }

// kernel: tpu_custom_call.1
= control target key start
LH: loop header
LB: loop body
LE: loop exit
PB: predicated region body
PF: predicated region fallthrough
CT: control target
= control target key end

     0   :  { %7 = vsyncpa [#allocation3], 0  ;;  %s176_s0 = inlined_call_operand.hbm [shape: f32[2,1024], index: 0, kind: input, shape index: {}]   ;;  %s177_s1 = inlined_call_operand.hbm [shape: f32[2,1536], index: 1, kind: input, shape index: {}]   ;;  %s178_s2 = inlined_call_operand.hbm [shape: f32[2,2560], index: 2, kind: output, shape index: {}]  }
   0x1   :  { %8 = vsyncpa [#allocation6], 0 }
   0x2   :  { %9 = vsyncpa [#allocation4], 0  ;;  %s15_s11 = sshll.u32 %s176_s0, 4  ;;  %s149_s12 = smov [#allocation2]   ;;  %s16_s11 = int_to_ptr.hbm [resolvable:$true] %s15_s11 }
   0x3   :  { %s17_s13 = sshll.u32 %s149_s12, 4  ;;  %s26_s16 = sshll.u32 %s177_s1, 4  ;;  %s18_s13 = int_to_ptr.vmem [resolvable:$true] %s17_s13  ;;  %s27_s16 = int_to_ptr.hbm [resolvable:$true] %s26_s16 }
   0x4   :  { %20 = dma.hbm_to_vmem [thread:$0]  %s16_s11, 256, %s18_s13, [#allocation3]  }
   0x5   :  { %s150_s17 = smov [#allocation5]  }
   0x6   :  { %s28_s18 = sshll.u32 %s150_s17, 4  ;;  %s29_s18 = int_to_ptr.vmem [resolvable:$true] %s28_s18 }
   0x7   :  { %31 = dma.hbm_to_vmem [thread:$0]  %s27_s16, 384, %s29_s18, [#allocation6]  }
   0x8   :  { %143 = dma.done.wait [#allocation3], 256  }
   0x9   :  { %144 = vsyncadd [#allocation3], 4294967040 }
   0xa   :  { %145 = dma.done.wait [#allocation6], 384  }
   0xb   :  { %146 = vsyncadd [#allocation6], 4294966912  ;;  %v40_v0 = vld [vmem:[#allocation2] sm:$0xff]  ;;  %v41_v1 = vld [vmem:[#allocation2 + $0x8] sm:$0xff]  ;;  %s151_s0 = smov [#allocation7]   ;;  %s57_s22 = sshll.u32 %s178_s2, 4  ;;  %s58_s22 = int_to_ptr.hbm [resolvable:$true] %s57_s22 }
   0xc   :  { %v44_v2 = vld [vmem:[#allocation5] sm:$0xff]  ;;  %s55_s19 = sshll.u32 %s151_s0, 4  ;;  %42 = vst [vmem:[#allocation7] sm:$0xff] %v40_v0  ;;  %v45_v3 = vld [vmem:[#allocation5 + $0x8] sm:$0xff]  ;;  %v46_v4 = vld [vmem:[#allocation5 + $0x10] sm:$0xff]  ;;  %s56_s19 = int_to_ptr.vmem [resolvable:$true] %s55_s19 }
   0xd   :  { %43 = vst [vmem:[#allocation7 + $0x8] sm:$0xff] %v41_v1 }
   0xe   :  { %47 = vst [vmem:[#allocation7 + $0x10] sm:$0xff] %v44_v2 }
   0xf   :  { %48 = vst [vmem:[#allocation7 + $0x18] sm:$0xff] %v45_v3 }
  0x10   :  { %49 = vst [vmem:[#allocation7 + $0x20] sm:$0xff] %v46_v4 }
  0x11   :  { %60 = dma.vmem_to_hbm [thread:$0]  %s56_s19, 640, %s58_s22, [#allocation4]  }
  0x12   :  { %147 = dma.done.wait [#allocation4], 640  }
  0x13   :  { %148 = vsyncadd [#allocation4], 4294966656 }
  0x14   :  { %65 = vsyncpa [#allocation3], 1 }
  0x15   :  { %66 = vsyncpa [#allocation6], 1 }
  0x16   :  { %67 = vsyncpa [#allocation4], 1 }

</bundles_post_ra>
